<compile_context>
chip_gen: v7x
topology: tpu7x:2x2x1
jax: 0.10.0
libtpu: 0.0.40
codegen_flags: <defaults>
</compile_context>

<pallas_src>
import functools

import jax
import jax.numpy as jnp
import numpy as np
from jax.experimental import pallas as pl
from jax.experimental.pallas import tpu as pltpu


def _conv_kernel(xb_ref, xh_ref, wa_ref, wb_ref, bias_ref, o_ref, *, TH, Wo, C):
    """One (row-tile, batch) step of the strided 3x3 conv.

    xb_ref  : (1, TH, 2, Wo+1, 2C)  folded input rows [t*TH, (t+1)*TH)
    xh_ref  : (1, 1,  1, Wo+1, 2C)  halo: folded row (t+1)*TH, parity 0
    wa_ref  : (3, 2C, C)            taps kx in {0,1}, rows ordered (kx, cin)
    wb_ref  : (3, C, C)             tap  kx = 2
    bias_ref: (1, C)                bias (f32)
    o_ref   : (1, TH, Wo, C)        output tile (NHWC)
    """
    f32 = jnp.float32

    def tap_pair(a, b, ky):
        # a: (rows, Wo, 2C) -> kx in {0,1};  b: (rows, Wo, C) -> kx = 2
        rows = a.shape[0]
        m = rows * Wo
        out = jnp.dot(a.reshape(m, 2 * C), wa_ref[ky],
                      preferred_element_type=f32)
        out = out + jnp.dot(b.reshape(m, C), wb_ref[ky],
                            preferred_element_type=f32)
        return out

    # ky = 0, 1 : the two row parities of the current folded rows.
    acc = tap_pair(xb_ref[0, :, 0, 0:Wo, :],
                   xb_ref[0, :, 0, 1:Wo + 1, 0:C], 0)
    acc = acc + tap_pair(xb_ref[0, :, 1, 0:Wo, :],
                         xb_ref[0, :, 1, 1:Wo + 1, 0:C], 1)

    # ky = 2 : next folded row, parity 0 (body rows 1..TH-1 plus the halo row).
    a_h = xh_ref[0, :, 0, 0:Wo, :]                # (1, Wo, 2C)
    b_h = xh_ref[0, :, 0, 1:Wo + 1, 0:C]          # (1, Wo, C)
    if TH > 1:
        a2 = jnp.concatenate([xb_ref[0, 1:TH, 0, 0:Wo, :], a_h], axis=0)
        b2 = jnp.concatenate([xb_ref[0, 1:TH, 0, 1:Wo + 1, 0:C], b_h], axis=0)
    else:
        a2, b2 = a_h, b_h
    acc = acc + tap_pair(a2, b2, 2)

    acc = acc + bias_ref[...].astype(f32)         # (TH*Wo, C) + (1, C)
    o_ref[...] = acc.reshape(1, TH, Wo, C).astype(o_ref.dtype)


def _pick_row_tile(Ho, Wo, C, in_isz, out_isz, budget_bytes):
    """Largest row tile whose per-step VMEM estimate fits the budget."""
    def est(th):
        body = 2 * th * 2 * (Wo + 1) * 2 * C * in_isz       # double-buffered body
        halo = 2 * (Wo + 1) * 2 * C * in_isz                # double-buffered halo
        wgt = 2 * (9 * C * C * in_isz) + 2 * C * 4          # weights + bias (x2 bufs)
        outb = 2 * th * Wo * C * out_isz                    # double-buffered output
        accm = th * Wo * C * 4                              # f32 accumulator
        slabs = th * Wo * 3 * C * in_isz                    # live tap operands
        internal = 2 * 1024 * 1024                          # Mosaic internal scratch
        return body + halo + wgt + outb + accm + slabs + internal

    th = 1
    for cand in range(1, Ho + 1):
        if est(cand) <= budget_bytes:
            th = cand
    return th


def downsample(x, weight_oihw, bias, *, compute_dtype=jnp.bfloat16,
               data_format="NCHW"):
    """Equivalent of DownSample.forward.

    x           : (B, C, H, W) if data_format == "NCHW", else (B, H, W, C)
                  (H, W must be even)
    weight_oihw : (C, C, 3, 3)   PyTorch Conv2d layout
    bias        : (C,)
    returns     : same data_format as the input, spatial dims halved
    """
    if data_format == "NCHW":
        B, C, H, W = x.shape
        x_nhwc = jnp.transpose(x, (0, 2, 3, 1))
    elif data_format == "NHWC":
        B, H, W, C = x.shape
        x_nhwc = x
    else:
        raise ValueError(f"unsupported data_format {data_format!r}")
    assert H % 2 == 0 and W % 2 == 0, "expects even spatial dims"
    Ho, Wo = H // 2, W // 2

    # ---- single XLA prep pass: (transpose+)pad by 2, then a free reshape -----
    # zf[b, p, q, u, v*C + c] = x_pad[b, 2p+q, 2u+v, c]
    xp = jnp.pad(x_nhwc, ((0, 0), (0, 2), (0, 2), (0, 0)))
    zf = xp.reshape(B, Ho + 1, 2, Wo + 1, 2 * C).astype(compute_dtype)

    # Weights split per kx group so each ky slab feeds one contiguous dot.
    w_hwio = jnp.transpose(weight_oihw, (2, 3, 1, 0)).astype(compute_dtype)
    wa = w_hwio[:, 0:2].reshape(3, 2 * C, C)      # (3, 2C, C): kx in {0,1}
    wb = w_hwio[:, 2]                             # (3,  C, C): kx = 2
    b2 = bias.reshape(1, C).astype(jnp.float32)

    # ---- generation-aware tile / VMEM sizing ---------------------------------
    in_isz = np.dtype(compute_dtype).itemsize
    out_isz = np.dtype(x.dtype).itemsize
    try:
        vmem_cap = pltpu.get_tpu_info().vmem_capacity_bytes
    except Exception:
        vmem_cap = 64 * 1024 * 1024               # conservative (v7x-sized)
    if vmem_cap >= 100 * 1024 * 1024:             # v5e / v6e: 128 MiB per core
        budget, vmem_limit = 80 * 1024 * 1024, 100 * 1024 * 1024
    else:                                         # v7x: 64 MiB per core
        budget, vmem_limit = 22 * 1024 * 1024, 44 * 1024 * 1024

    TH = _pick_row_tile(Ho, Wo, C, in_isz, out_isz, budget)
    if B == 1:                                    # keep both TCs busy at B == 1
        TH = min(TH, max(1, pl.cdiv(Ho, 2)))
    n_tiles = pl.cdiv(Ho, TH)

    # Put the larger parallel extent first (megacore / v7x core split).
    if n_tiles >= B:
        grid = (n_tiles, B)
        split = lambda i, j: (j, i)               # -> (batch, tile)
    else:
        grid = (B, n_tiles)
        split = lambda i, j: (i, j)

    def body_map(i, j):
        b, t = split(i, j)
        return (b, t, 0, 0, 0)

    def halo_map(i, j):
        b, t = split(i, j)
        # Clamp keeps the ragged last tile in bounds; the clamped row only
        # feeds output rows that Pallas discards on writeback.
        return (b, jnp.minimum((t + 1) * TH, Ho), 0, 0, 0)

    def wgt_map(i, j):
        return (0, 0, 0)

    def bias_map(i, j):
        return (0, 0)

    def out_map(i, j):
        b, t = split(i, j)
        return (b, t, 0, 0)

    kernel = functools.partial(_conv_kernel, TH=TH, Wo=Wo, C=C)

    out_nhwc = pl.pallas_call(
        kernel,
        out_shape=jax.ShapeDtypeStruct((B, Ho, Wo, C), x.dtype),
        grid_spec=pltpu.PrefetchScalarGridSpec(
            num_scalar_prefetch=0,
            grid=grid,
            in_specs=[
                # body rows of this tile
                pl.BlockSpec((1, TH, 2, Wo + 1, 2 * C), body_map),
                # 1-row halo (parity 0 only), same array -> no extra HBM copy
                pl.BlockSpec((1, 1, 1, Wo + 1, 2 * C), halo_map),
                # weights / bias: constant index maps -> fetched once
                pl.BlockSpec((3, 2 * C, C), wgt_map),
                pl.BlockSpec((3, C, C), wgt_map),
                pl.BlockSpec((1, C), bias_map),
            ],
            out_specs=pl.BlockSpec((1, TH, Wo, C), out_map),
        ),
        compiler_params=pltpu.CompilerParams(
            dimension_semantics=("parallel", "parallel"),
            vmem_limit_bytes=vmem_limit,
        ),
    )(zf, zf, wa, wb, b2)

    if data_format == "NHWC":
        return out_nhwc
    return jnp.transpose(out_nhwc, (0, 3, 1, 2))


if __name__ == "__main__":
    def reference(x, weight, bias):
        x_pad = jnp.pad(x, ((0, 0), (0, 0), (0, 1), (0, 1)))
        return jax.lax.conv_general_dilated(
            x_pad, weight, window_strides=(2, 2), padding="VALID",
            dimension_numbers=("NCHW", "OIHW", "NCHW"),
        ) + bias[None, :, None, None]

    keys = jax.random.split(jax.random.PRNGKey(0), 6)

    # --- Config A: small module-default shape, exact f32 compute path --------
    B, C, H, W = 2, 4, 16, 16
    x = jax.random.normal(keys[0], (B, C, H, W), jnp.float32)
    bound = 1.0 / np.sqrt(C * 9)
    w = jax.random.uniform(keys[1], (C, C, 3, 3), jnp.float32, -bound, bound)
    b = jax.random.uniform(keys[2], (C,), jnp.float32, -bound, bound)

    fwd_f32 = jax.jit(functools.partial(downsample, compute_dtype=jnp.float32))
    out = jax.block_until_ready(fwd_f32(x, w, b))
    ref = reference(x, w, b)
    np.testing.assert_allclose(np.asarray(out), np.asarray(ref),
                               rtol=1e-4, atol=1e-4)

    # NHWC boundary path (skips both layout passes) must match too.
    fwd_nhwc = jax.jit(functools.partial(downsample, compute_dtype=jnp.float32,
                                         data_format="NHWC"))
    out_nhwc = jax.block_until_ready(
        fwd_nhwc(jnp.transpose(x, (0, 2, 3, 1)), w, b))
    np.testing.assert_allclose(
        np.asarray(jnp.transpose(out_nhwc, (0, 3, 1, 2))), np.asarray(ref),
        rtol=1e-4, atol=1e-4)

    # --- Config B: default bf16 fast path, B=1 exercises the core-split tile --
    B, C, H, W = 1, 16, 32, 32
    x = jax.random.normal(keys[3], (B, C, H, W), jnp.float32)
    bound = 1.0 / np.sqrt(C * 9)
    w = jax.random.uniform(keys[4], (C, C, 3, 3), jnp.float32, -bound, bound)
    b = jax.random.uniform(keys[5], (C,), jnp.float32, -bound, bound)

    fwd_bf16 = jax.jit(downsample)                 # default compute_dtype=bf16
    out = jax.block_until_ready(fwd_bf16(x, w, b))
    x_q = x.astype(jnp.bfloat16).astype(jnp.float32)
    w_q = w.astype(jnp.bfloat16).astype(jnp.float32)
    ref = reference(x_q, w_q, b)                   # same cast, f32 accumulation
    np.testing.assert_allclose(np.asarray(out), np.asarray(ref),
                               rtol=1e-2, atol=1e-2)

    print("KERNEL_OK")
</pallas_src>

<mosaic_0001>
module attributes {stable_mosaic.version = 11 : i64} {
  func.func @_conv_kernel(%arg0: i32, %arg1: i32, %arg2: memref<1x8x2x9x8xf32, #tpu.memory_space<vmem>>, %arg3: memref<1x1x1x9x8xf32, #tpu.memory_space<vmem>>, %arg4: memref<3x8x4xf32, #tpu.memory_space<vmem>>, %arg5: memref<3x4x4xf32, #tpu.memory_space<vmem>>, %arg6: memref<1x4xf32, #tpu.memory_space<vmem>>, %arg7: memref<1x8x8x4xf32, #tpu.memory_space<vmem>>) attributes {dimension_semantics = [#tpu.dimension_semantics<parallel>, #tpu.dimension_semantics<parallel>], iteration_bounds = array<i64: 2, 1>, scalar_prefetch = 0 : i64, scratch_operands = 0 : i64, tpu.core_type = #tpu.core_type<tc>, window_params = [{transform_indices = @transform_0, window_bounds = array<i64: 1, 8, 2, 9, 8>}, {transform_indices = @transform_1, window_bounds = array<i64: 1, 1, 1, 9, 8>}, {pipeline_mode = #tpu.pipeline_mode<synchronous>, transform_indices = @transform_2, window_bounds = array<i64: 3, 8, 4>}, {pipeline_mode = #tpu.pipeline_mode<synchronous>, transform_indices = @transform_3, window_bounds = array<i64: 3, 4, 4>}, {pipeline_mode = #tpu.pipeline_mode<synchronous>, transform_indices = @transform_4, window_bounds = array<i64: 1, 4>}, {transform_indices = @transform_5, window_bounds = array<i64: 1, 8, 8, 4>}]} {
    %c0 = arith.constant 0 : index
    %c0_0 = arith.constant 0 : index
    %c0_1 = arith.constant 0 : index
    %c0_2 = arith.constant 0 : index
    %c0_3 = arith.constant 0 : index
    %0 = vector.load %arg2[%c0, %c0_0, %c0_1, %c0_2, %c0_3] : memref<1x8x2x9x8xf32, #tpu.memory_space<vmem>>, vector<1x8x1x8x8xf32>
    %1 = vector.shape_cast %0 : vector<1x8x1x8x8xf32> to vector<8x8x8xf32>
    %c0_4 = arith.constant 0 : index
    %c0_5 = arith.constant 0 : index
    %c0_6 = arith.constant 0 : index
    %c1 = arith.constant 1 : index
    %c0_7 = arith.constant 0 : index
    %2 = vector.load %arg2[%c0_4, %c0_5, %c0_6, %c1, %c0_7] : memref<1x8x2x9x8xf32, #tpu.memory_space<vmem>>, vector<1x8x1x8x4xf32>
    %3 = vector.shape_cast %2 : vector<1x8x1x8x4xf32> to vector<8x8x4xf32>
    %4 = vector.shape_cast %1 : vector<8x8x8xf32> to vector<64x8xf32>
    %c0_8 = arith.constant 0 : index
    %c0_9 = arith.constant 0 : index
    %c0_10 = arith.constant 0 : index
    %5 = vector.load %arg4[%c0_8, %c0_9, %c0_10] : memref<3x8x4xf32, #tpu.memory_space<vmem>>, vector<1x8x4xf32>
    %6 = vector.shape_cast %5 : vector<1x8x4xf32> to vector<8x4xf32>
    %cst = arith.constant dense<0.000000e+00> : vector<64x4xf32>
    %7 = tpu.matmul %4, %6, %cst {dimension_numbers = #tpu.dot_dimension_numbers<[1], [0], [0], [1], [0, 0, 1, 1], [], []>} : vector<64x8xf32>, vector<8x4xf32>, vector<64x4xf32> -> vector<64x4xf32>
    %8 = vector.shape_cast %3 : vector<8x8x4xf32> to vector<64x4xf32>
    %c0_11 = arith.constant 0 : index
    %c0_12 = arith.constant 0 : index
    %c0_13 = arith.constant 0 : index
    %9 = vector.load %arg5[%c0_11, %c0_12, %c0_13] : memref<3x4x4xf32, #tpu.memory_space<vmem>>, vector<1x4x4xf32>
    %10 = vector.shape_cast %9 : vector<1x4x4xf32> to vector<4x4xf32>
    %cst_14 = arith.constant dense<0.000000e+00> : vector<64x4xf32>
    %11 = tpu.matmul %8, %10, %cst_14 {dimension_numbers = #tpu.dot_dimension_numbers<[1], [0], [0], [1], [0, 0, 1, 1], [], []>} : vector<64x4xf32>, vector<4x4xf32>, vector<64x4xf32> -> vector<64x4xf32>
    %12 = arith.addf %7, %11 : vector<64x4xf32>
    %c0_15 = arith.constant 0 : index
    %c0_16 = arith.constant 0 : index
    %c1_17 = arith.constant 1 : index
    %c0_18 = arith.constant 0 : index
    %c0_19 = arith.constant 0 : index
    %13 = vector.load %arg2[%c0_15, %c0_16, %c1_17, %c0_18, %c0_19] : memref<1x8x2x9x8xf32, #tpu.memory_space<vmem>>, vector<1x8x1x8x8xf32>
    %14 = vector.shape_cast %13 : vector<1x8x1x8x8xf32> to vector<8x8x8xf32>
    %c0_20 = arith.constant 0 : index
    %c0_21 = arith.constant 0 : index
    %c1_22 = arith.constant 1 : index
    %c1_23 = arith.constant 1 : index
    %c0_24 = arith.constant 0 : index
    %15 = vector.load %arg2[%c0_20, %c0_21, %c1_22, %c1_23, %c0_24] : memref<1x8x2x9x8xf32, #tpu.memory_space<vmem>>, vector<1x8x1x8x4xf32>
    %16 = vector.shape_cast %15 : vector<1x8x1x8x4xf32> to vector<8x8x4xf32>
    %17 = vector.shape_cast %14 : vector<8x8x8xf32> to vector<64x8xf32>
    %c1_25 = arith.constant 1 : index
    %c0_26 = arith.constant 0 : index
    %c0_27 = arith.constant 0 : index
    %18 = vector.load %arg4[%c1_25, %c0_26, %c0_27] : memref<3x8x4xf32, #tpu.memory_space<vmem>>, vector<1x8x4xf32>
    %19 = vector.shape_cast %18 : vector<1x8x4xf32> to vector<8x4xf32>
    %cst_28 = arith.constant dense<0.000000e+00> : vector<64x4xf32>
    %20 = tpu.matmul %17, %19, %cst_28 {dimension_numbers = #tpu.dot_dimension_numbers<[1], [0], [0], [1], [0, 0, 1, 1], [], []>} : vector<64x8xf32>, vector<8x4xf32>, vector<64x4xf32> -> vector<64x4xf32>
    %21 = vector.shape_cast %16 : vector<8x8x4xf32> to vector<64x4xf32>
    %c1_29 = arith.constant 1 : index
    %c0_30 = arith.constant 0 : index
    %c0_31 = arith.constant 0 : index
    %22 = vector.load %arg5[%c1_29, %c0_30, %c0_31] : memref<3x4x4xf32, #tpu.memory_space<vmem>>, vector<1x4x4xf32>
    %23 = vector.shape_cast %22 : vector<1x4x4xf32> to vector<4x4xf32>
    %cst_32 = arith.constant dense<0.000000e+00> : vector<64x4xf32>
    %24 = tpu.matmul %21, %23, %cst_32 {dimension_numbers = #tpu.dot_dimension_numbers<[1], [0], [0], [1], [0, 0, 1, 1], [], []>} : vector<64x4xf32>, vector<4x4xf32>, vector<64x4xf32> -> vector<64x4xf32>
    %25 = arith.addf %20, %24 : vector<64x4xf32>
    %26 = arith.addf %12, %25 : vector<64x4xf32>
    %c0_33 = arith.constant 0 : index
    %c0_34 = arith.constant 0 : index
    %c0_35 = arith.constant 0 : index
    %c0_36 = arith.constant 0 : index
    %c0_37 = arith.constant 0 : index
    %27 = vector.load %arg3[%c0_33, %c0_34, %c0_35, %c0_36, %c0_37] : memref<1x1x1x9x8xf32, #tpu.memory_space<vmem>>, vector<1x1x1x8x8xf32>
    %28 = vector.shape_cast %27 : vector<1x1x1x8x8xf32> to vector<1x8x8xf32>
    %c0_38 = arith.constant 0 : index
    %c0_39 = arith.constant 0 : index
    %c0_40 = arith.constant 0 : index
    %c1_41 = arith.constant 1 : index
    %c0_42 = arith.constant 0 : index
    %29 = vector.load %arg3[%c0_38, %c0_39, %c0_40, %c1_41, %c0_42] : memref<1x1x1x9x8xf32, #tpu.memory_space<vmem>>, vector<1x1x1x8x4xf32>
    %30 = vector.shape_cast %29 : vector<1x1x1x8x4xf32> to vector<1x8x4xf32>
    %c0_43 = arith.constant 0 : index
    %c1_44 = arith.constant 1 : index
    %c0_45 = arith.constant 0 : index
    %c0_46 = arith.constant 0 : index
    %c0_47 = arith.constant 0 : index
    %31 = vector.load %arg2[%c0_43, %c1_44, %c0_45, %c0_46, %c0_47] : memref<1x8x2x9x8xf32, #tpu.memory_space<vmem>>, vector<1x7x1x8x8xf32>
    %32 = vector.shape_cast %31 : vector<1x7x1x8x8xf32> to vector<7x8x8xf32>
    %33 = tpu.concatenate %32, %28 in 0 : vector<7x8x8xf32>, vector<1x8x8xf32> -> vector<8x8x8xf32>
    %c0_48 = arith.constant 0 : index
    %c1_49 = arith.constant 1 : index
    %c0_50 = arith.constant 0 : index
    %c1_51 = arith.constant 1 : index
    %c0_52 = arith.constant 0 : index
    %34 = vector.load %arg2[%c0_48, %c1_49, %c0_50, %c1_51, %c0_52] : memref<1x8x2x9x8xf32, #tpu.memory_space<vmem>>, vector<1x7x1x8x4xf32>
    %35 = vector.shape_cast %34 : vector<1x7x1x8x4xf32> to vector<7x8x4xf32>
    %36 = tpu.concatenate %35, %30 in 0 : vector<7x8x4xf32>, vector<1x8x4xf32> -> vector<8x8x4xf32>
    %37 = vector.shape_cast %33 : vector<8x8x8xf32> to vector<64x8xf32>
    %c2 = arith.constant 2 : index
    %c0_53 = arith.constant 0 : index
    %c0_54 = arith.constant 0 : index
    %38 = vector.load %arg4[%c2, %c0_53, %c0_54] : memref<3x8x4xf32, #tpu.memory_space<vmem>>, vector<1x8x4xf32>
    %39 = vector.shape_cast %38 : vector<1x8x4xf32> to vector<8x4xf32>
    %cst_55 = arith.constant dense<0.000000e+00> : vector<64x4xf32>
    %40 = tpu.matmul %37, %39, %cst_55 {dimension_numbers = #tpu.dot_dimension_numbers<[1], [0], [0], [1], [0, 0, 1, 1], [], []>} : vector<64x8xf32>, vector<8x4xf32>, vector<64x4xf32> -> vector<64x4xf32>
    %41 = vector.shape_cast %36 : vector<8x8x4xf32> to vector<64x4xf32>
    %c2_56 = arith.constant 2 : index
    %c0_57 = arith.constant 0 : index
    %c0_58 = arith.constant 0 : index
    %42 = vector.load %arg5[%c2_56, %c0_57, %c0_58] : memref<3x4x4xf32, #tpu.memory_space<vmem>>, vector<1x4x4xf32>
    %43 = vector.shape_cast %42 : vector<1x4x4xf32> to vector<4x4xf32>
    %cst_59 = arith.constant dense<0.000000e+00> : vector<64x4xf32>
    %44 = tpu.matmul %41, %43, %cst_59 {dimension_numbers = #tpu.dot_dimension_numbers<[1], [0], [0], [1], [0, 0, 1, 1], [], []>} : vector<64x4xf32>, vector<4x4xf32>, vector<64x4xf32> -> vector<64x4xf32>
    %45 = arith.addf %40, %44 : vector<64x4xf32>
    %46 = arith.addf %26, %45 : vector<64x4xf32>
    %c0_60 = arith.constant 0 : index
    %c0_61 = arith.constant 0 : index
    %47 = vector.load %arg6[%c0_60, %c0_61] : memref<1x4xf32, #tpu.memory_space<vmem>>, vector<1x4xf32>
    %48 = vector.broadcast %47 : vector<1x4xf32> to vector<64x4xf32>
    %49 = arith.addf %46, %48 : vector<64x4xf32>
    %50 = vector.shape_cast %49 : vector<64x4xf32> to vector<1x8x8x4xf32>
    %c0_62 = arith.constant 0 : index
    %c0_63 = arith.constant 0 : index
    %c0_64 = arith.constant 0 : index
    %c0_65 = arith.constant 0 : index
    %51 = vector.load %arg7[%c0_62, %c0_63, %c0_64, %c0_65] : memref<1x8x8x4xf32, #tpu.memory_space<vmem>>, vector<1x8x8x4xf32>
    tpu.vector_store %arg7[%c0_62, %c0_63, %c0_64, %c0_65], %50 {strides = array<i32>} : memref<1x8x8x4xf32, #tpu.memory_space<vmem>>, vector<1x8x8x4xf32>,
    return
  }
  func.func @transform_0(%arg0: i32, %arg1: i32) -> (i32, i32, i32, i32, i32) {
    %c0_i32 = arith.constant 0 : i32
    %c0_i32_0 = arith.constant 0 : i32
    %c0_i32_1 = arith.constant 0 : i32
    %c0_i32_2 = arith.constant 0 : i32
    return %arg0, %arg1, %c0_i32, %c0_i32_0, %c0_i32_1 : i32, i32, i32, i32, i32
  }
  func.func @transform_1(%arg0: i32, %arg1: i32) -> (i32, i32, i32, i32, i32) {
    %c1_i32 = arith.constant 1 : i32
    %0 = arith.addi %arg1, %c1_i32 : i32
    %c8_i32 = arith.constant 8 : i32
    %1 = arith.muli %0, %c8_i32 : i32
    %c8_i32_0 = arith.constant 8 : i32
    %2 = arith.minsi %1, %c8_i32_0 : i32
    %c0_i32 = arith.constant 0 : i32
    %c0_i32_1 = arith.constant 0 : i32
    %c0_i32_2 = arith.constant 0 : i32
    %c0_i32_3 = arith.constant 0 : i32
    return %arg0, %2, %c0_i32, %c0_i32_1, %c0_i32_2 : i32, i32, i32, i32, i32
  }
  func.func @transform_2(%arg0: i32, %arg1: i32) -> (i32, i32, i32) {
    %c0_i32 = arith.constant 0 : i32
    %c0_i32_0 = arith.constant 0 : i32
    %c0_i32_1 = arith.constant 0 : i32
    %c0_i32_2 = arith.constant 0 : i32
    return %c0_i32, %c0_i32_0, %c0_i32_1 : i32, i32, i32
  }
  func.func @transform_3(%arg0: i32, %arg1: i32) -> (i32, i32, i32) {
    %c0_i32 = arith.constant 0 : i32
    %c0_i32_0 = arith.constant 0 : i32
    %c0_i32_1 = arith.constant 0 : i32
    %c0_i32_2 = arith.constant 0 : i32
    return %c0_i32, %c0_i32_0, %c0_i32_1 : i32, i32, i32
  }
  func.func @transform_4(%arg0: i32, %arg1: i32) -> (i32, i32) {
    %c0_i32 = arith.constant 0 : i32
    %c0_i32_0 = arith.constant 0 : i32
    %c0_i32_1 = arith.constant 0 : i32
    return %c0_i32, %c0_i32_0 : i32, i32
  }
  func.func @transform_5(%arg0: i32, %arg1: i32) -> (i32, i32, i32, i32) {
    %c0_i32 = arith.constant 0 : i32
    %c0_i32_0 = arith.constant 0 : i32
    %c0_i32_1 = arith.constant 0 : i32
    return %arg0, %arg1, %c0_i32, %c0_i32_0 : i32, i32, i32, i32
  }
}

</mosaic_0001>

<bundles_post_ra>
// kernel: downsample.1
= control target key start
LH: loop header
LB: loop body
LE: loop exit
PB: predicated region body
PF: predicated region fallthrough
CT: control target
= control target key end

     0   :  { %s1714_s18 = smov 0   ;;  %s1716_s19 = smov 0   ;;  %s1889_s0 = inlined_call_operand.vmem [shape: f32[2,9,2,9,8], index: 0, kind: input, shape index: {}, may-alias: {0,1}]   ;;  %s1890_s1 = inlined_call_operand.vmem [shape: f32[2,9,2,9,8], index: 1, kind: input, shape index: {}, may-alias: {0,1}]   ;;  %s1891_s2 = inlined_call_operand.vmem [shape: f32[3,8,4], index: 2, kind: input, shape index: {}]   ;;  %s1892_s3 = inlined_call_operand.vmem [shape: f32[3,4,4], index: 3, kind: input, shape index: {}]   ;;  %s1893_s4 = inlined_call_operand.vmem [shape: f32[1,4], index: 4, kind: input, shape index: {}]   ;;  %s1894_s5 = inlined_call_operand.vmem [shape: f32[2,8,8,4], index: 5, kind: output, shape index: {}]  }
   0x1   :  { %s1718_s20 = smov 0  }
   0x2 LB: > { %s27_s21 = sadd.s32 1, %s1678_s19  ;;  %p1359_p0 = scmp.ge.s32.totalorder %s1682_s20, 1  ;;  %s1682_s20 = sphi %s1718_s20, %s15_s20   ;;  %s1678_s19 = sphi %s1716_s19, %s1896_s19   ;;  %s1674_s18 = sphi %s1714_s18, %s1895_s18  }
   0x3   : > { %p29_p1 = scmp.ge.s32.totalorder %s27_s21, 2  ;;  %p253_p2 = scmp.lt.s32.totalorder %s1682_s20, 3 }
   0x5   : > { %s1898_s21 = smov (%p29_p1, %s27_s21), 0  ;;  %p254_p3 = pnand %p1359_p0, %p253_p2 }
   0x6   : > { %v376_v0 = vld [vmem:[%s1892_s3] sm:$0xf] (!%p254_p3)  ;;  %vm402_vm0 = vcmask (!%p254_p3), 1043456   ;;  %v1397_v1 = vld [vmem:[%s1891_s2 + $0x8] sm:$0xff] (!%p254_p3)  ;;  %p316_p4 = scmp.lt.s32.totalorder (!%p254_p3), %s1674_s18, 1  ;;  %vm377_vm1 = vcmask (!%p254_p3), 31744  }
   0x7   : > { %257 = sbr.rel (%p254_p3) target bundleno = 282 (0x11a), region = 40  ;;  %1509 = vmatprep.subr.msk.mxu1 (!%p254_p3), %vm402_vm0, %v376_v0  ;;  %1551 = vmatprep.subr.mxu0 (!%p254_p3), %v1397_v1  ;;  %v375_v2 = vld [vmem:[%s1891_s2] sm:$0xff] (!%p254_p3)  ;;  %v1431_v3 = vld [vmem:[%s1892_s3 + $0x8] sm:$0xf] (!%p254_p3)  ;;  %vm511_vm2 = vcmask (!%p254_p3), 64512   ;;  %v1430_v11 = vld [vmem:[%s1891_s2 + $0x10] sm:$0xff] (!%p254_p3) }
   0x8   : > { %1510 = vmatpush3.msk.msra.mxu1 (!%p254_p3), %vm402_vm0, %v376_v0  ;;  %1552 = vmatpush3.msra.mxu0 (!%p254_p3), %v1397_v1  ;;  %v1398_v10 = vld [vmem:[%s1892_s3 + $0x4] sm:$0xf] (!%p254_p3)  ;;  %v1449_v42 = vld [vmem:[%s1893_s4] ss:$0 sm:$0xff] (!%p254_p3) }
   0x9   : > { %1523 = vmatprep.subr.mxu1 (!%p254_p3), %v375_v2  ;;  %1565 = vmatprep.subr.msk.mxu0 (!%p254_p3), %vm402_vm0, %v1431_v3 }
   0xe   : > { %s1900_s18 = smov (!%p316_p4, %s1674_s18), 1 }
   0xf   : > { %s1633_s30 = smul.u32 288, %s1900_s18  ;;  %s1454_s17 = sshll.u32 %s1900_s18, 6 }
  0x10   : > { %s1862_s26 = scalar_lea.vmem %s1894_s5, %s1454_s17 }
  0x11   : > { %s1755_s8 = scalar_lea.vmem %s1889_s0, %s1633_s30  ;;  %s1453_s13 = sadd.s32 256, %s1633_s30 }
  0x12   : > { %v367_v4 = vld [vmem:[%s1755_s8 + $0x1] sm:$0xff]  ;;  %v1381_v5 = vld [vmem:[%s1755_s8 + $0x10] sm:$0xff]  ;;  %s1820_s16 = scalar_lea.vmem %s1890_s1, %s1453_s13 }
  0x13   : > { %v368_v6 = vld [vmem:[%s1755_s8 + $0x21] sm:$0xff]  ;;  %1511 = vmatprep.mubr.msk.f32.mxu1 %vm377_vm1, %v367_v4  ;;  %1553 = vmatprep.mubr.msk.f32.mxu0 %vm511_vm2, %v1381_v5  ;;  %v1382_v7 = vld [vmem:[%s1755_s8 + $0x30] sm:$0xff] }
  0x14   : > { %v369_v8 = vld [vmem:[%s1755_s8 + $0x41] sm:$0xff]  ;;  %v1383_v9 = vld [vmem:[%s1755_s8 + $0x50] sm:$0xff]  ;;  %1512 = vmatmul.mubr.msk.f32.vlgmr.msra.gmra.mrb[0].mxu1 %vm377_vm1, %v368_v6  ;;  %1554 = vmatmul.mubr.msk.f32.vlgmr.msra.gmra.mrb[0].mxu0 %vm511_vm2, %v1382_v7 }
  0x15   : > { %1524 = vmatpush3.msra.mxu1 %v375_v2  ;;  %1566 = vmatpush3.msk.msra.mxu0 %vm402_vm0, %v1431_v3  ;;  %v370_v12 = vld [vmem:[%s1755_s8 + $0x61] sm:$0xff]  ;;  %v1384_v13 = vld [vmem:[%s1755_s8 + $0x70] sm:$0xff] }
  0x16   : > { %1514 = vmatprep.mubr.msk.f32.mxu1 %vm377_vm1, %v369_v8  ;;  %1556 = vmatprep.mubr.msk.f32.mxu0 %vm511_vm2, %v1383_v9  ;;  %v371_v14 = vld [vmem:[%s1755_s8 + $0x81] sm:$0xff]  ;;  %v1385_v15 = vld [vmem:[%s1755_s8 + $0x90] sm:$0xff] }
  0x17   : > { %1537 = vmatprep.subr.msk.mxu1 %vm402_vm0, %v1398_v10  ;;  %1579 = vmatprep.subr.mxu0 %v1430_v11  ;;  %v372_v16 = vld [vmem:[%s1755_s8 + $0xa1] sm:$0xff]  ;;  %v1386_v17 = vld [vmem:[%s1755_s8 + $0xb0] sm:$0xff] }
  0x18   : > { %1515 = vmatmul.mubr.msk.f32.gmra.mrb[2].mxu1 %vm377_vm1, %v370_v12  ;;  %1557 = vmatmul.mubr.msk.f32.gmra.mrb[2].mxu0 %vm511_vm2, %v1384_v13  ;;  %v373_v18 = vld [vmem:[%s1755_s8 + $0xc1] sm:$0xff]  ;;  %v1387_v19 = vld [vmem:[%s1755_s8 + $0xd0] sm:$0xff] }
  0x19   : > { %1517 = vmatprep.mubr.msk.f32.mxu1 %vm377_vm1, %v371_v14  ;;  %1559 = vmatprep.mubr.msk.f32.mxu0 %vm511_vm2, %v1385_v15  ;;  %v374_v20 = vld [vmem:[%s1755_s8 + $0xe1] sm:$0xff]  ;;  %v1388_v21 = vld [vmem:[%s1755_s8 + $0xf0] sm:$0xff] }
  0x1a   : > { %v359_v22 = vld [vmem:[%s1755_s8] sm:$0xff]  ;;  %v1389_v31 = vld [vmem:[%s1755_s8 + $0x11] sm:$0xff] }
  0x1b   : > { %v360_v23 = vld [vmem:[%s1755_s8 + $0x20] sm:$0xff]  ;;  %v1390_v32 = vld [vmem:[%s1755_s8 + $0x31] sm:$0xff] }
  0x1c   : > { %1518 = vmatmul.mubr.msk.f32.gmra.mrb[4].mxu1 %vm377_vm1, %v372_v16  ;;  %1560 = vmatmul.mubr.msk.f32.gmra.mrb[4].mxu0 %vm511_vm2, %v1386_v17  ;;  %v361_v24 = vld [vmem:[%s1755_s8 + $0x40] sm:$0xff]  ;;  %v1391_v33 = vld [vmem:[%s1755_s8 + $0x51] sm:$0xff] }
  0x1d   : > { %1520 = vmatprep.mubr.msk.f32.mxu1 %vm377_vm1, %v373_v18  ;;  %1562 = vmatprep.mubr.msk.f32.mxu0 %vm511_vm2, %v1387_v19  ;;  %v362_v25 = vld [vmem:[%s1755_s8 + $0x60] sm:$0xff]  ;;  %v1392_v34 = vld [vmem:[%s1755_s8 + $0x71] sm:$0xff] }
  0x1e   : > { %v363_v26 = vld [vmem:[%s1755_s8 + $0x80] sm:$0xff]  ;;  %v1393_v35 = vld [vmem:[%s1755_s8 + $0x91] sm:$0xff] }
  0x1f   : > { %v364_v27 = vld [vmem:[%s1755_s8 + $0xa0] sm:$0xff]  ;;  %v1394_v36 = vld [vmem:[%s1755_s8 + $0xb1] sm:$0xff] }
  0x20   : > { %1521 = vmatmul.mubr.msk.f32.gmra.mrb[6].mxu1 %vm377_vm1, %v374_v20  ;;  %1563 = vmatmul.mubr.msk.f32.gmra.mrb[6].mxu0 %vm511_vm2, %v1388_v21  ;;  %v365_v28 = vld [vmem:[%s1755_s8 + $0xc0] sm:$0xff]  ;;  %v1395_v37 = vld [vmem:[%s1755_s8 + $0xd1] sm:$0xff] }
  0x21   : > { %1525 = vmatprep.mubr.msk.f32.mxu1 %vm511_vm2, %v359_v22  ;;  %1567 = vmatprep.mubr.msk.f32.mxu0 %vm377_vm1, %v368_v6  ;;  %v366_v29 = vld [vmem:[%s1755_s8 + $0xe0] sm:$0xff]  ;;  %v1396_v38 = vld [vmem:[%s1755_s8 + $0xf1] sm:$0xff] }
  0x22   : > { %v932_v30 = vld [vmem:[%s1820_s16 + $0x1] sm:$0xff] }
  0x23   : > { %v931_v39 = vld [vmem:[%s1820_s16] sm:$0xff] }
  0x24   : > { %1526 = vmatmul.mubr.msk.f32.vlgmr.msra.gmra.mrb[0].mxu1 %vm511_vm2, %v360_v23  ;;  %1568 = vmatmul.mubr.msk.f32.vlgmr.msra.gmra.mrb[0].mxu0 %vm377_vm1, %v369_v8 }
  0x25   : > { %1538 = vmatpush3.msk.msra.mxu1 %vm402_vm0, %v1398_v10  ;;  %1580 = vmatpush3.msra.mxu0 %v1430_v11 }
  0x26   : > { %1528 = vmatprep.mubr.msk.f32.mxu1 %vm511_vm2, %v361_v24  ;;  %1570 = vmatprep.mubr.msk.f32.mxu0 %vm377_vm1, %v370_v12 }
  0x28   : > { %1529 = vmatmul.mubr.msk.f32.gmra.mrb[2].mxu1 %vm511_vm2, %v362_v25  ;;  %1571 = vmatmul.mubr.msk.f32.gmra.mrb[2].mxu0 %vm377_vm1, %v371_v14 }
  0x29   : > { %1531 = vmatprep.mubr.msk.f32.mxu1 %vm511_vm2, %v363_v26  ;;  %1573 = vmatprep.mubr.msk.f32.mxu0 %vm377_vm1, %v372_v16 }
  0x2c   : > { %1532 = vmatmul.mubr.msk.f32.gmra.mrb[4].mxu1 %vm511_vm2, %v364_v27  ;;  %1574 = vmatmul.mubr.msk.f32.gmra.mrb[4].mxu0 %vm377_vm1, %v373_v18 }
  0x2d   : > { %1534 = vmatprep.mubr.msk.f32.mxu1 %vm511_vm2, %v365_v28  ;;  %1576 = vmatprep.mubr.msk.f32.mxu0 %vm377_vm1, %v374_v20 }
  0x30   : > { %1535 = vmatmul.mubr.msk.f32.gmra.mrb[6].mxu1 %vm511_vm2, %v366_v29  ;;  %1577 = vmatmul.mubr.msk.f32.gmra.mrb[6].mxu0 %vm377_vm1, %v932_v30 }
  0x31   : > { %1539 = vmatprep.mubr.msk.f32.mxu1 %vm377_vm1, %v1389_v31  ;;  %1581 = vmatprep.mubr.msk.f32.mxu0 %vm511_vm2, %v360_v23 }
  0x34   : > { %1540 = vmatmul.mubr.msk.f32.vlgmr.msra.gmra.mrb[0].mxu1 %vm377_vm1, %v1390_v32  ;;  %1582 = vmatmul.mubr.msk.f32.vlgmr.msra.gmra.mrb[0].mxu0 %vm511_vm2, %v361_v24 }
  0x35   : > { %1542 = vmatprep.mubr.msk.f32.mxu1 %vm377_vm1, %v1391_v33  ;;  %1584 = vmatprep.mubr.msk.f32.mxu0 %vm511_vm2, %v362_v25 }
  0x38   : > { %1543 = vmatmul.mubr.msk.f32.gmra.mrb[2].mxu1 %vm377_vm1, %v1392_v34  ;;  %1585 = vmatmul.mubr.msk.f32.gmra.mrb[2].mxu0 %vm511_vm2, %v363_v26 }
  0x39   : > { %1545 = vmatprep.mubr.msk.f32.mxu1 %vm377_vm1, %v1393_v35  ;;  %1587 = vmatprep.mubr.msk.f32.mxu0 %vm511_vm2, %v364_v27 }
  0x3c   : > { %1546 = vmatmul.mubr.msk.f32.gmra.mrb[4].mxu1 %vm377_vm1, %v1394_v36  ;;  %1588 = vmatmul.mubr.msk.f32.gmra.mrb[4].mxu0 %vm511_vm2, %v365_v28 }
  0x3d   : > { %1548 = vmatprep.mubr.msk.f32.mxu1 %vm377_vm1, %v1395_v37  ;;  %1590 = vmatprep.mubr.msk.f32.mxu0 %vm511_vm2, %v366_v29 }
  0x40   : > { %1549 = vmatmul.mubr.msk.f32.gmra.mrb[6].mxu1 %vm377_vm1, %v1396_v38  ;;  %1591 = vmatmul.mubr.msk.f32.gmra.mrb[6].mxu0 %vm511_vm2, %v931_v39 }
 0x107   : > { %v1541_v40 = vpop.f32.mrb[0].mxu1  ;;  %v1583_v41 = vpop.f32.mrb[0].mxu0 }
 0x108   : > { %v1593_v43 = vadd.f32 %v1583_v41, %v1541_v40  ;;  %v755_v44 = vpop.f32.mrb[1].mxu1  ;;  %v1174_v45 = vpop.f32.mrb[1].mxu0 }
 0x109   : > { %v1594_v46 = vadd.f32 %v1174_v45, %v755_v44 }
 0x10a   : > { %v1229_v47 = vadd.f32 %v1593_v43, %v1449_v42 }
 0x10b   : > { %v1228_v48 = vadd.f32 %v1594_v46, %v1449_v42  ;;  %v1544_v49 = vpop.f32.mrb[2].mxu1  ;;  %v1586_v50 = vpop.f32.mrb[2].mxu0 }
 0x10c   : > { %1237 = vst.msk [vmem:[%s1862_s26 + $0x8] sm:$0xff] %vm377_vm1, %v1229_v47  ;;  %v1595_v51 = vadd.f32 %v1586_v50, %v1544_v49  ;;  %v765_v52 = vpop.f32.mrb[3].mxu1  ;;  %v1184_v53 = vpop.f32.mrb[3].mxu0 }
 0x10d   : > { %1236 = vst.msk [vmem:[%s1862_s26] sm:$0xff] %vm377_vm1, %v1228_v48  ;;  %v1596_v54 = vadd.f32 %v1184_v53, %v765_v52 }
 0x10e   : > { %v1231_v55 = vadd.f32 %v1595_v51, %v1449_v42 }
 0x10f   : > { %v1230_v56 = vadd.f32 %v1596_v54, %v1449_v42  ;;  %v1547_v57 = vpop.f32.mrb[4].mxu1  ;;  %v1589_v58 = vpop.f32.mrb[4].mxu0 }
 0x110   : > { %1239 = vst.msk [vmem:[%s1862_s26 + $0x18] sm:$0xff] %vm377_vm1, %v1231_v55  ;;  %v1597_v59 = vadd.f32 %v1589_v58, %v1547_v57  ;;  %v775_v60 = vpop.f32.mrb[5].mxu1  ;;  %v1194_v61 = vpop.f32.mrb[5].mxu0 }
 0x111   : > { %1238 = vst.msk [vmem:[%s1862_s26 + $0x10] sm:$0xff] %vm377_vm1, %v1230_v56  ;;  %v1598_v62 = vadd.f32 %v1194_v61, %v775_v60 }
 0x112   : > { %v1233_v63 = vadd.f32 %v1597_v59, %v1449_v42 }
 0x113   : > { %v1232_v0 = vadd.f32 %v1598_v62, %v1449_v42  ;;  %v1550_v1 = vpop.f32.mrb[6].mxu1  ;;  %v1592_v2 = vpop.f32.mrb[6].mxu0 }
 0x114   : > { %1241 = vst.msk [vmem:[%s1862_s26 + $0x28] sm:$0xff] %vm377_vm1, %v1233_v63  ;;  %v1599_v3 = vadd.f32 %v1592_v2, %v1550_v1  ;;  %v785_v4 = vpop.f32.mrb[7].mxu1  ;;  %v1204_v5 = vpop.f32.mrb[7].mxu0 }
 0x115   : > { %1240 = vst.msk [vmem:[%s1862_s26 + $0x20] sm:$0xff] %vm377_vm1, %v1232_v0  ;;  %v1600_v6 = vadd.f32 %v1204_v5, %v785_v4 }
 0x116   : > { %v1235_v7 = vadd.f32 %v1599_v3, %v1449_v42 }
 0x117   : > { %v1234_v8 = vadd.f32 %v1600_v6, %v1449_v42 }
 0x118   : > { %1243 = vst.msk [vmem:[%s1862_s26 + $0x38] sm:$0xff] %vm377_vm1, %v1235_v7 }
 0x119   : > { %1242 = vst.msk [vmem:[%s1862_s26 + $0x30] sm:$0xff] %vm377_vm1, %v1234_v8 }
 0x11a PF: > { %s15_s20 = sadd.s32 1, %s1682_s20   ;;  %s1895_s18 = smov %s1678_s19 }
 0x11b   : > { %p12_p5 = scmp.ge.s32.totalorder %s15_s20, 4   ;;  %s1896_s19 = smov %s1898_s21 }
 0x11d   :  { %14 = sbr.rel (!%p12_p5) target bundleno = 2 (0x2), region = 79 }

</bundles_post_ra>
